<compile_context>
chip_gen: v7x
topology: tpu7x:2x2x1
jax: 0.10.0
libtpu: 0.0.40
codegen_flags: <defaults>
</compile_context>

<pallas_src>
import math

import jax
import jax.numpy as jnp
from jax import lax
from jax.experimental import pallas as pl
from jax.experimental.pallas import tpu as pltpu


def _pick_tile(total, candidates=(512, 256, 128)):
    """Largest candidate tile dividing `total`, else the full extent."""
    for c in candidates:
        if total % c == 0:
            return c
    return total


def _round_up(x, m):
    return (x + m - 1) // m * m


# ---------------------------------------------------------------------------
# Kernel 1: fused QKV projection  (x @ W_qkv + b_qkv), one wide MXU matmul.
# ---------------------------------------------------------------------------
def qkv_proj_kernel(x_ref, w_ref, b_ref, q_ref, k_ref, v_ref):
    h = q_ref.shape[-1]
    # (TM, H) @ (H, 3H) -> (TM, 3H), f32 accumulation on the MXU.
    acc = jnp.dot(x_ref[...], w_ref[...], preferred_element_type=jnp.float32)
    acc = acc + b_ref[...]                      # (1, 3H) broadcasts over rows
    # Lane-aligned static slices (H is a multiple of 128 after padding).
    q_ref[...] = acc[:, :h].astype(q_ref.dtype)
    k_ref[...] = acc[:, h:2 * h].astype(k_ref.dtype)
    v_ref[...] = acc[:, 2 * h:].astype(v_ref.dtype)


# ---------------------------------------------------------------------------
# Kernel 2: flash-style attention with online softmax over K/V tiles.
# ---------------------------------------------------------------------------
def attention_kernel(q_ref, k_ref, v_ref, o_ref, m_sc, l_sc, acc_sc):
    ki = pl.program_id(2)

    @pl.when(ki == 0)
    def _():
        m_sc[...] = jnp.full_like(m_sc, -jnp.inf)
        l_sc[...] = jnp.zeros_like(l_sc)
        acc_sc[...] = jnp.zeros_like(acc_sc)

    q = q_ref[0]          # (TQ, H); 1/sqrt(dim) already folded into W_q / b_q
    k = k_ref[0]          # (TK, H)
    v = v_ref[0]          # (TK, H)

    # Scores: contract the last dims directly (no in-kernel transpose of K).
    s = lax.dot_general(q, k, (((1,), (1,)), ((), ())),
                        preferred_element_type=jnp.float32)       # (TQ, TK)

    # Online softmax (all vector math in f32).
    m_prev = m_sc[...]
    m_new = jnp.maximum(m_prev, jnp.max(s, axis=-1, keepdims=True))
    alpha = jnp.exp(m_prev - m_new)
    p = jnp.exp(s - m_new)
    l_sc[...] = alpha * l_sc[...] + jnp.sum(p, axis=-1, keepdims=True)
    acc_sc[...] = alpha * acc_sc[...] + jnp.dot(
        p.astype(v.dtype), v, preferred_element_type=jnp.float32)
    m_sc[...] = m_new

    @pl.when(ki == pl.num_programs(2) - 1)
    def _():
        inv = pl.reciprocal(l_sc[...], approx=True)               # EUP vrcp
        o_ref[0] = (acc_sc[...] * inv).astype(o_ref.dtype)


# ---------------------------------------------------------------------------
# Wrapper
# ---------------------------------------------------------------------------
def attention_block(x, wq, bq, wk, bk, wv, bv, *, compute_dtype=None):
    """x: (B, S, H); weights PyTorch nn.Linear style W=[H_out, H_in], y=xW^T+b."""
    B, S, H = x.shape
    out_dtype = x.dtype
    if compute_dtype is None:
        compute_dtype = x.dtype

    # ---- host-side parameter prep ------------------------------------------
    scale = 1.0 / math.sqrt(H)            # module uses hidden_dim ** 0.5
    Hp = _round_up(H, 128)                # lane-dense hidden dim
    pad = Hp - H

    def prep_w(w, s=1.0):                 # -> (H_in, H_out), zero-padded
        wt = (w.astype(jnp.float32) * s).T
        return jnp.pad(wt, ((0, pad), (0, pad)))

    def prep_b(b, s=1.0):
        return jnp.pad(b.astype(jnp.float32) * s, (0, pad))

    # Fuse Q/K/V into one [Hp, 3Hp] weight; fold the attention scale into Q.
    w_qkv = jnp.concatenate(
        [prep_w(wq, scale), prep_w(wk), prep_w(wv)], axis=1)       # (Hp, 3Hp)
    b_qkv = jnp.concatenate(
        [prep_b(bq, scale), prep_b(bk), prep_b(bv)])[None, :]      # (1, 3Hp)

    x_p = x
    if pad:
        x_p = jnp.pad(x, ((0, 0), (0, 0), (0, pad)))

    # bf16 MXU operands if requested; bias stays f32 (added to f32 accumulator).
    x_p = x_p.astype(compute_dtype)
    w_qkv = w_qkv.astype(compute_dtype)

    # ---- kernel 1: fused QKV projection over flattened B*S rows ------------
    M = B * S
    TM = _pick_tile(M)
    x_flat = x_p.reshape(M, Hp)
    qkv_shape = jax.ShapeDtypeStruct((M, Hp), compute_dtype)

    q, k, v = pl.pallas_call(
        qkv_proj_kernel,
        out_shape=(qkv_shape, qkv_shape, qkv_shape),
        grid_spec=pltpu.PrefetchScalarGridSpec(
            num_scalar_prefetch=0,
            grid=(M // TM,),
            in_specs=[
                pl.BlockSpec((TM, Hp), lambda i: (i, 0)),          # x rows
                pl.BlockSpec((Hp, 3 * Hp), lambda i: (0, 0)),      # fused W
                pl.BlockSpec((1, 3 * Hp), lambda i: (0, 0)),       # fused bias
            ],
            out_specs=[
                pl.BlockSpec((TM, Hp), lambda i: (i, 0)),
                pl.BlockSpec((TM, Hp), lambda i: (i, 0)),
                pl.BlockSpec((TM, Hp), lambda i: (i, 0)),
            ],
        ),
        compiler_params=pltpu.CompilerParams(
            dimension_semantics=("parallel",)),
    )(x_flat, w_qkv, b_qkv)
    # TODO(synk): for very large H (f32 weights >= ~2048) stream W_qkv from HBM
    # (memory_space=pl.ANY + manual double-buffered DMA over K slices) instead
    # of keeping it VMEM-resident, to fit v7x's 64 MiB VMEM.

    q = q.reshape(B, S, Hp)
    k = k.reshape(B, S, Hp)
    v = v.reshape(B, S, Hp)

    # ---- kernel 2: flash attention, Q tiled, K/V streamed ------------------
    TQ = _pick_tile(S)
    TK = _pick_tile(S)

    out = pl.pallas_call(
        attention_kernel,
        out_shape=jax.ShapeDtypeStruct((B, S, Hp), out_dtype),
        grid_spec=pltpu.PrefetchScalarGridSpec(
            num_scalar_prefetch=0,
            grid=(B, S // TQ, S // TK),
            in_specs=[
                pl.BlockSpec((1, TQ, Hp), lambda b, qi, ki: (b, qi, 0)),
                pl.BlockSpec((1, TK, Hp), lambda b, qi, ki: (b, ki, 0)),
                pl.BlockSpec((1, TK, Hp), lambda b, qi, ki: (b, ki, 0)),
            ],
            out_specs=pl.BlockSpec((1, TQ, Hp), lambda b, qi, ki: (b, qi, 0)),
            scratch_shapes=[
                pltpu.VMEM((TQ, 1), jnp.float32),    # running max
                pltpu.VMEM((TQ, 1), jnp.float32),    # running denom
                pltpu.VMEM((TQ, Hp), jnp.float32),   # output accumulator
            ],
        ),
        compiler_params=pltpu.CompilerParams(
            dimension_semantics=("parallel", "parallel", "arbitrary")),
    )(q, k, v)

    if pad:
        out = out[:, :, :H]
    return out


def reference(x, wq, bq, wk, bk, wv, bv):
    # pure-JAX reference (matches the PyTorch forward)
    q = x @ wq.T + bq
    k = x @ wk.T + bk
    v = x @ wv.T + bv
    s = (q @ jnp.swapaxes(k, -2, -1)) / (x.shape[-1] ** 0.5)
    a = jax.nn.softmax(s, axis=-1)
    return a @ v


if __name__ == "__main__":
    B, S, H = 2, 8, 32
    key = jax.random.PRNGKey(0)
    kx, kwq, kbq, kwk, kbk, kwv, kbv = jax.random.split(key, 7)

    x = jax.random.normal(kx, (B, S, H), dtype=jnp.float32)
    bound = 1.0 / (H ** 0.5)
    wq = jax.random.uniform(kwq, (H, H), jnp.float32, -bound, bound)
    bq = jax.random.uniform(kbq, (H,), jnp.float32, -bound, bound)
    wk = jax.random.uniform(kwk, (H, H), jnp.float32, -bound, bound)
    bk = jax.random.uniform(kbk, (H,), jnp.float32, -bound, bound)
    wv = jax.random.uniform(kwv, (H, H), jnp.float32, -bound, bound)
    bv = jax.random.uniform(kbv, (H,), jnp.float32, -bound, bound)

    ref = reference(x, wq, bq, wk, bk, wv, bv)

    # f32 path (approx reciprocal in softmax -> ~1e-3 rel error budget)
    out = attention_block(x, wq, bq, wk, bk, wv, bv)
    out = jax.block_until_ready(out)
    assert out.shape == (B, S, H)
    assert out.dtype == x.dtype
    assert jnp.allclose(out, ref, atol=5e-3, rtol=5e-3), (
        float(jnp.max(jnp.abs(out - ref))))

    # bf16 MXU-operand path (f32 accumulation; looser tolerance)
    out_bf16 = attention_block(x, wq, bq, wk, bk, wv, bv,
                               compute_dtype=jnp.bfloat16)
    out_bf16 = jax.block_until_ready(out_bf16)
    assert jnp.allclose(out_bf16, ref, atol=1e-1, rtol=1e-1)

    print("KERNEL_OK")
</pallas_src>

<mosaic_0001>
module attributes {stable_mosaic.version = 11 : i64} {
  func.func @qkv_proj_kernel(%arg0: i32, %arg1: memref<16x128xf32, #tpu.memory_space<vmem>>, %arg2: memref<128x384xf32, #tpu.memory_space<vmem>>, %arg3: memref<1x384xf32, #tpu.memory_space<vmem>>, %arg4: memref<16x128xf32, #tpu.memory_space<vmem>>, %arg5: memref<16x128xf32, #tpu.memory_space<vmem>>, %arg6: memref<16x128xf32, #tpu.memory_space<vmem>>) attributes {dimension_semantics = [#tpu.dimension_semantics<parallel>], iteration_bounds = array<i64: 1>, scalar_prefetch = 0 : i64, scratch_operands = 0 : i64, tpu.core_type = #tpu.core_type<tc>, window_params = [{transform_indices = @transform_0, window_bounds = array<i64: 16, 128>}, {pipeline_mode = #tpu.pipeline_mode<synchronous>, transform_indices = @transform_1, window_bounds = array<i64: 128, 384>}, {pipeline_mode = #tpu.pipeline_mode<synchronous>, transform_indices = @transform_2, window_bounds = array<i64: 1, 384>}, {transform_indices = @transform_3, window_bounds = array<i64: 16, 128>}, {transform_indices = @transform_4, window_bounds = array<i64: 16, 128>}, {transform_indices = @transform_5, window_bounds = array<i64: 16, 128>}]} {
    %c0 = arith.constant 0 : index
    %c0_0 = arith.constant 0 : index
    %0 = vector.load %arg1[%c0, %c0_0] : memref<16x128xf32, #tpu.memory_space<vmem>>, vector<16x128xf32>
    %c0_1 = arith.constant 0 : index
    %c0_2 = arith.constant 0 : index
    %1 = vector.load %arg2[%c0_1, %c0_2] : memref<128x384xf32, #tpu.memory_space<vmem>>, vector<128x384xf32>
    %cst = arith.constant dense<0.000000e+00> : vector<16x384xf32>
    %2 = tpu.matmul %0, %1, %cst {dimension_numbers = #tpu.dot_dimension_numbers<[1], [0], [0], [1], [0, 0, 1, 1], [], []>} : vector<16x128xf32>, vector<128x384xf32>, vector<16x384xf32> -> vector<16x384xf32>
    %c0_3 = arith.constant 0 : index
    %c0_4 = arith.constant 0 : index
    %3 = vector.load %arg3[%c0_3, %c0_4] : memref<1x384xf32, #tpu.memory_space<vmem>>, vector<1x384xf32>
    %4 = vector.broadcast %3 : vector<1x384xf32> to vector<16x384xf32>
    %5 = arith.addf %2, %4 : vector<16x384xf32>
    %6 = vector.extract_strided_slice %5 {offsets = [0, 0], sizes = [16, 128], strides = [1, 1]} : vector<16x384xf32> to vector<16x128xf32>
    %c0_5 = arith.constant 0 : index
    %c0_6 = arith.constant 0 : index
    %7 = vector.load %arg4[%c0_5, %c0_6] : memref<16x128xf32, #tpu.memory_space<vmem>>, vector<16x128xf32>
    tpu.vector_store %arg4[%c0_5, %c0_6], %6 {strides = array<i32>} : memref<16x128xf32, #tpu.memory_space<vmem>>, vector<16x128xf32>,
    %8 = vector.extract_strided_slice %5 {offsets = [0, 128], sizes = [16, 128], strides = [1, 1]} : vector<16x384xf32> to vector<16x128xf32>
    %c0_7 = arith.constant 0 : index
    %c0_8 = arith.constant 0 : index
    %9 = vector.load %arg5[%c0_7, %c0_8] : memref<16x128xf32, #tpu.memory_space<vmem>>, vector<16x128xf32>
    tpu.vector_store %arg5[%c0_7, %c0_8], %8 {strides = array<i32>} : memref<16x128xf32, #tpu.memory_space<vmem>>, vector<16x128xf32>,
    %10 = vector.extract_strided_slice %5 {offsets = [0, 256], sizes = [16, 128], strides = [1, 1]} : vector<16x384xf32> to vector<16x128xf32>
    %c0_9 = arith.constant 0 : index
    %c0_10 = arith.constant 0 : index
    %11 = vector.load %arg6[%c0_9, %c0_10] : memref<16x128xf32, #tpu.memory_space<vmem>>, vector<16x128xf32>
    tpu.vector_store %arg6[%c0_9, %c0_10], %10 {strides = array<i32>} : memref<16x128xf32, #tpu.memory_space<vmem>>, vector<16x128xf32>,
    return
  }
  func.func @transform_0(%arg0: i32) -> (i32, i32) {
    %c0_i32 = arith.constant 0 : i32
    %c0_i32_0 = arith.constant 0 : i32
    return %arg0, %c0_i32 : i32, i32
  }
  func.func @transform_1(%arg0: i32) -> (i32, i32) {
    %c0_i32 = arith.constant 0 : i32
    %c0_i32_0 = arith.constant 0 : i32
    %c0_i32_1 = arith.constant 0 : i32
    return %c0_i32, %c0_i32_0 : i32, i32
  }
  func.func @transform_2(%arg0: i32) -> (i32, i32) {
    %c0_i32 = arith.constant 0 : i32
    %c0_i32_0 = arith.constant 0 : i32
    %c0_i32_1 = arith.constant 0 : i32
    return %c0_i32, %c0_i32_0 : i32, i32
  }
  func.func @transform_3(%arg0: i32) -> (i32, i32) {
    %c0_i32 = arith.constant 0 : i32
    %c0_i32_0 = arith.constant 0 : i32
    return %arg0, %c0_i32 : i32, i32
  }
  func.func @transform_4(%arg0: i32) -> (i32, i32) {
    %c0_i32 = arith.constant 0 : i32
    %c0_i32_0 = arith.constant 0 : i32
    return %arg0, %c0_i32 : i32, i32
  }
  func.func @transform_5(%arg0: i32) -> (i32, i32) {
    %c0_i32 = arith.constant 0 : i32
    %c0_i32_0 = arith.constant 0 : i32
    return %arg0, %c0_i32 : i32, i32
  }
}

</mosaic_0001>

<bundles_post_ra>
// kernel: tpu_custom_call.1
= control target key start
LH: loop header
LB: loop body
LE: loop exit
PB: predicated region body
PF: predicated region fallthrough
CT: control target
= control target key end

     0   :  { %11 = vsyncpa [#allocation3], 0  ;;  %s697_s0 = inlined_call_operand.hbm [shape: f32[16,128], index: 0, kind: input, shape index: {}]   ;;  %s698_s1 = inlined_call_operand.hbm [shape: f32[128,384], index: 1, kind: input, shape index: {}]   ;;  %s699_s2 = inlined_call_operand.vmem [shape: f32[1,384], index: 2, kind: input, shape index: {}]   ;;  %s700_s3 = inlined_call_operand.hbm [shape: f32[16,128], index: 3, kind: output, shape index: {0}]   ;;  %s701_s4 = inlined_call_operand.hbm [shape: f32[16,128], index: 4, kind: output, shape index: {1}]   ;;  %s702_s5 = inlined_call_operand.hbm [shape: f32[16,128], index: 5, kind: output, shape index: {2}]  }
   0x1   :  { %12 = vsyncpa [#allocation6], 0 }
   0x2   :  { %13 = vsyncpa [#allocation4], 0 }
   0x3   :  { %14 = vsyncpa [#allocation9], 0  ;;  %s566_s18 = smov [#allocation2]   ;;  %s448_s22 = scalar_lea.hbm %s697_s0, 256 }
   0x4   :  { %s20_s19 = sshll.u32 %s566_s18, 4  ;;  %p449_p0 = scmp.ne.s32.totalorder %s697_s0, %s448_s22  ;;  %s21_s19 = int_to_ptr.vmem [resolvable:$true] %s20_s19 }
   0x5   :  { %p452_p1 = scmp.lt.u32.totalorder %s448_s22, %s697_s0 }
   0x7   :  { %p454_p2 = pnand %p452_p1, %p449_p0 }
   0x9   :  { %457 = shalt.err (!%p454_p2)
}
   0xa   :  { %s458_s27 = scalar_lea.vmem %s21_s19, 256  ;;  %p463_p4 = scmp.lt.s32.totalorder %s21_s19, %s21_s19 }
   0xb   :  { %p459_p3 = scmp.ne.s32.totalorder %s21_s19, %s458_s27  ;;  %p464_p5 = scmp.lt.s32.totalorder %s458_s27, %s458_s27 }
   0xd   :  { %p465_p6 = por %p464_p5, %p463_p4 }
   0xf   :  { %p466_p7 = pnand %p465_p6, %p459_p3 }
  0x11   :  { %469 = shalt.err (!%p466_p7)
}
  0x12   :  { %s567_s28 = smov 128   ;;  %s568_s29 = smov 8  }
  0x13   :  { %26 = dma.hbm_to_vmem [thread:$0]  %s697_s0, 256, %s21_s19, [#allocation3], %s567_s28, %s567_s28, %s568_s29  }
  0x14   :  { %s569_s7 = smov [#allocation5]   ;;  %s470_s11 = scalar_lea.hbm %s698_s1, 6144 }
  0x15   :  { %s32_s8 = sshll.u32 %s569_s7, 4  ;;  %p471_p8 = scmp.ne.s32.totalorder %s698_s1, %s470_s11  ;;  %s33_s8 = int_to_ptr.vmem [resolvable:$true] %s32_s8 }
  0x16   :  { %p474_p9 = scmp.lt.u32.totalorder %s470_s11, %s698_s1 }
  0x18   :  { %p476_p10 = pnand %p474_p9, %p471_p8 }
  0x1a   :  { %479 = shalt.err (!%p476_p10)
}
  0x1b   :  { %s480_s16 = scalar_lea.vmem %s33_s8, 6144  ;;  %p485_p12 = scmp.lt.s32.totalorder %s33_s8, %s33_s8 }
  0x1c   :  { %p481_p11 = scmp.ne.s32.totalorder %s33_s8, %s480_s16  ;;  %p486_p13 = scmp.lt.s32.totalorder %s480_s16, %s480_s16 }
  0x1e   :  { %p487_p0 = por %p486_p13, %p485_p12 }
  0x20   :  { %p488_p1 = pnand %p487_p0, %p481_p11 }
  0x22   :  { %491 = shalt.err (!%p488_p1)
}
  0x23   :  { %s570_s0 = smov 384   ;;  %s571_s17 = smov 24  }
  0x24   :  { %38 = dma.hbm_to_vmem [thread:$0]  %s698_s1, 6144, %s33_s8, [#allocation6], %s570_s0, %s570_s0, %s571_s17  }
  0x25   :  { %558 = dma.done.wait [#allocation3], 256  }
  0x26   :  { %559 = vsyncadd [#allocation3], 4294967040 }
  0x27   :  { %560 = dma.done.wait [#allocation6], 6144  }
  0x28   :  { %561 = vsyncadd [#allocation6], 4294961152  ;;  %v572_v0 = vmov 0.0   ;;  %v50_v1 = vld [vmem:[#allocation5 + $0x8] sm:$0xff]  ;;  %v53_v2 = vld [vmem:[#allocation5 + $0x20] sm:$0xff]  ;;  %s573_s21 = smov [#allocation7]  }
  0x29   :  { %178 = vmatprep.mubr.f32.mxu0 %v572_v0  ;;  %v49_v3 = vld [vmem:[#allocation5] sm:$0xff]  ;;  %v374_v4 = vpack.c.bf16 %v53_v2, %v50_v1  ;;  %v52_v5 = vld [vmem:[#allocation5 + $0x18] sm:$0xff]  ;;  %v59_v7 = vld [vmem:[#allocation5 + $0x50] sm:$0xff]  ;;  %s277_s22 = sshll.u32 %s573_s21, 4  ;;  %s574_s23 = smov [#allocation8]   ;;  %s278_s22 = int_to_ptr.vmem [resolvable:$true] %s277_s22 }
  0x2a   :  { %v56_v6 = vld [vmem:[#allocation5 + $0x38] sm:$0xff]  ;;  %v376_v8 = vpack.c.bf16 %v52_v5, %v49_v3  ;;  %v51_v10 = vld [vmem:[#allocation5 + $0x10] sm:$0xff]  ;;  %v54_v11 = vld [vmem:[#allocation5 + $0x28] sm:$0xff]  ;;  %s289_s24 = sshll.u32 %s574_s23, 4  ;;  %s492_s26 = scalar_lea.vmem %s278_s22, 256  ;;  %s638_s24 = int_to_ptr.vmem [resolvable:$true] %s289_s24 }
  0x2b   :  { %v378_v9 = vpack.c.bf16 %v59_v7, %v56_v6  ;;  %v55_v12 = vld [vmem:[#allocation5 + $0x30] sm:$0xff]  ;;  %375 = vmatprep.subr.bf16.mxu0 %v374_v4  ;;  %v406_v13 = vpack.c.bf16 %v54_v11, %v51_v10  ;;  %v58_v14 = vld [vmem:[#allocation5 + $0x48] sm:$0xff]  ;;  %v65_v16 = vld [vmem:[#allocation5 + $0x80] sm:$0xff]  ;;  %p493_p2 = scmp.ne.s32.totalorder %s278_s22, %s492_s26  ;;  %p497_p3 = scmp.lt.s32.totalorder %s278_s22, %s278_s22 }
  0x2c   :  { %v62_v15 = vld [vmem:[#allocation5 + $0x68] sm:$0xff]  ;;  %377 = vmatpush1.bf16.msra.mxu0 %v376_v8  ;;  %v380_v17 = vpack.c.bf16 %v58_v14, %v55_v12  ;;  %v57_v18 = vld [vmem:[#allocation5 + $0x40] sm:$0xff]  ;;  %v60_v19 = vld [vmem:[#allocation5 + $0x58] sm:$0xff]  ;;  %v99_v12 = vlaneseq  ;;  %p498_p4 = scmp.lt.s32.totalorder %s492_s26, %s492_s26 }
  0x2d   :  { %379 = vmatprep.subr.bf16.mxu0 %v378_v9  ;;  %407 = vmatprep.subr.bf16.mxu1 %v406_v13  ;;  %v382_v20 = vpack.c.bf16 %v65_v16, %v62_v15  ;;  %v410_v21 = vpack.c.bf16 %v60_v19, %v57_v18  ;;  %v61_v22 = vld [vmem:[#allocation5 + $0x60] sm:$0xff]  ;;  %v64_v23 = vld [vmem:[#allocation5 + $0x78] sm:$0xff]  ;;  %v71_v25 = vld [vmem:[#allocation5 + $0xb0] sm:$0xff] }
  0x2e   :  { %v68_v24 = vld [vmem:[#allocation5 + $0x98] sm:$0xff]  ;;  %409 = vmatpush3.bf16.msra.mxu1 %v406_v13  ;;  %v63_v26 = vld [vmem:[#allocation5 + $0x70] sm:$0xff]  ;;  %v66_v27 = vld [vmem:[#allocation5 + $0x88] sm:$0xff]  ;;  %v384_v29 = vpack.c.bf16 %v64_v23, %v61_v22  ;;  %v100_v13 = vshrl.u32 %v99_v12, 7  ;;  %p499_p5 = por %p498_p4, %p497_p3 }
  0x2f   :  { %411 = vmatprep.subr.bf16.mxu1 %v410_v21  ;;  %v414_v28 = vpack.c.bf16 %v66_v27, %v63_v26  ;;  %v69_v30 = vld [vmem:[#allocation5 + $0xa0] sm:$0xff]  ;;  %v72_v31 = vld [vmem:[#allocation5 + $0xb8] sm:$0xff]  ;;  %v386_v32 = vpack.c.bf16 %v71_v25, %v68_v24  ;;  %v67_v33 = vld [vmem:[#allocation5 + $0x90] sm:$0xff] }
  0x30   :  { %381 = vmatpush1.bf16.msra.mxu0 %v380_v17  ;;  %v70_v34 = vld [vmem:[#allocation5 + $0xa8] sm:$0xff]  ;;  %v77_v36 = vld [vmem:[#allocation5 + $0xe0] sm:$0xff]  ;;  %v418_v37 = vpack.c.bf16 %v72_v31, %v69_v30  ;;  %v75_v39 = vld [vmem:[#allocation5 + $0xd0] sm:$0xff]  ;;  %v101_v14 = vsub.s32 0, %v100_v13  ;;  %v105_v16 = vsub.s32 1, %v100_v13  ;;  %v109_v17 = vsub.s32 2, %v100_v13  ;;  %p500_p6 = pnand %p499_p5, %p493_p2 }
  0x31   :  { %383 = vmatprep.subr.bf16.mxu0 %v382_v20  ;;  %v74_v35 = vld [vmem:[#allocation5 + $0xc8] sm:$0xff]  ;;  %v388_v38 = vpack.c.bf16 %v70_v34, %v67_v33  ;;  %v73_v42 = vld [vmem:[#allocation5 + $0xc0] sm:$0xff]  ;;  %v76_v43 = vld [vmem:[#allocation5 + $0xd8] sm:$0xff] }
  0x32   :  { %413 = vmatpush3.bf16.msra.mxu1 %v410_v21  ;;  %v78_v40 = vld [vmem:[#allocation5 + $0xe8] sm:$0xff]  ;;  %v390_v41 = vpack.c.bf16 %v77_v36, %v74_v35  ;;  %v80_v44 = vld [vmem:[#allocation5 + $0xf8] sm:$0xff]  ;;  %v83_v45 = vld [vmem:[#allocation5 + $0x110] sm:$0xff]  ;;  %v392_v48 = vpack.c.bf16 %v76_v43, %v73_v42 }
  0x33   :  { %415 = vmatprep.subr.bf16.mxu1 %v414_v28  ;;  %v422_v46 = vpack.c.bf16 %v78_v40, %v75_v39  ;;  %v47_v47 = vld [vmem:[#allocation2] sm:$0xff]  ;;  %v81_v49 = vld [vmem:[#allocation5 + $0x100] sm:$0xff]  ;;  %v84_v50 = vld [vmem:[#allocation5 + $0x118] sm:$0xff]  ;;  %v394_v51 = vpack.c.bf16 %v83_v45, %v80_v44 }
  0x34   :  { %385 = vmatpush1.bf16.msra.mxu0 %v384_v29  ;;  %371 = vmatprep.mubr.f32.mxu1 %v47_v47  ;;  %v79_v52 = vld [vmem:[#allocation5 + $0xf0] sm:$0xff]  ;;  %v82_v53 = vld [vmem:[#allocation5 + $0x108] sm:$0xff]  ;;  %v89_v55 = vld [vmem:[#allocation5 + $0x140] sm:$0xff]  ;;  %v426_v56 = vpack.c.bf16 %v84_v50, %v81_v49 }
  0x35   :  { %387 = vmatprep.subr.bf16.mxu0 %v386_v32  ;;  %v86_v54 = vld [vmem:[#allocation5 + $0x128] sm:$0xff]  ;;  %v396_v57 = vpack.c.bf16 %v82_v53, %v79_v52  ;;  %v87_v58 = vld [vmem:[#allocation5 + $0x130] sm:$0xff]  ;;  %v85_v61 = vld [vmem:[#allocation5 + $0x120] sm:$0xff] }
  0x36   :  { %417 = vmatpush3.bf16.msra.mxu1 %v414_v28  ;;  %v90_v59 = vld [vmem:[#allocation5 + $0x148] sm:$0xff]  ;;  %v398_v60 = vpack.c.bf16 %v89_v55, %v86_v54  ;;  %v88_v62 = vld [vmem:[#allocation5 + $0x138] sm:$0xff]  ;;  %v95_v1 = vld [vmem:[#allocation5 + $0x170] sm:$0xff] }
  0x37   :  { %419 = vmatprep.subr.bf16.mxu1 %v418_v37  ;;  %v92_v63 = vld [vmem:[#allocation5 + $0x158] sm:$0xff]  ;;  %v430_v2 = vpack.c.bf16 %v90_v59, %v87_v58  ;;  %v400_v3 = vpack.c.bf16 %v88_v62, %v85_v61  ;;  %v93_v4 = vld [vmem:[#allocation5 + $0x160] sm:$0xff]  ;;  %v91_v7 = vld [vmem:[#allocation5 + $0x150] sm:$0xff] }
  0x38   :  { %389 = vmatpush1.bf16.msra.mxu0 %v388_v38  ;;  %v96_v5 = vld [vmem:[#allocation5 + $0x178] sm:$0xff]  ;;  %v402_v6 = vpack.c.bf16 %v95_v1, %v92_v63  ;;  %v94_v8 = vld [vmem:[#allocation5 + $0x168] sm:$0xff]  ;;  %v97_v15 = vld [vmem:[%s699_s2] sm:$0x7]  ;;  %s575_s2 = smov [#allocation10]  }
  0x39   :  { %391 = vmatprep.subr.bf16.mxu0 %v390_v41  ;;  %v434_v9 = vpack.c.bf16 %v96_v5, %v93_v4  ;;  %v404_v10 = vpack.c.bf16 %v94_v8, %v91_v7  ;;  %v48_v11 = vld [vmem:[#allocation2 + $0x8] sm:$0xff]  ;;  %v102_v18 = vrot.slane %v97_v15, %v101_v14  ;;  %v106_v19 = vrot.slane %v97_v15, %v105_v16  ;;  %s301_s25 = sshll.u32 %s575_s2, 4  ;;  %s640_s25 = int_to_ptr.vmem [resolvable:$true] %s301_s25 }
  0x3a   :  { %421 = vmatpush3.bf16.msra.mxu1 %v418_v37  ;;  %v110_v20 = vrot.slane %v97_v15, %v109_v17 }
  0x3b   :  { %423 = vmatprep.subr.bf16.mxu1 %v422_v46 }
  0x3c   :  { %393 = vmatpush1.bf16.msra.mxu0 %v392_v48 }
  0x3d   :  { %395 = vmatprep.subr.bf16.mxu0 %v394_v51 }
  0x3e   :  { %425 = vmatpush3.bf16.msra.mxu1 %v422_v46 }
  0x3f   :  { %427 = vmatprep.subr.bf16.mxu1 %v426_v56 }
  0x40   :  { %397 = vmatpush1.bf16.msra.mxu0 %v396_v57 }
  0x41   :  { %399 = vmatprep.subr.bf16.mxu0 %v398_v60 }
  0x42   :  { %429 = vmatpush3.bf16.msra.mxu1 %v426_v56 }
  0x43   :  { %431 = vmatprep.subr.bf16.mxu1 %v430_v2 }
  0x44   :  { %401 = vmatpush1.bf16.msra.mxu0 %v400_v3 }
  0x45   :  { %403 = vmatprep.subr.bf16.mxu0 %v402_v6 }
  0x46   :  { %433 = vmatpush3.bf16.msra.mxu1 %v430_v2 }
  0x47   :  { %435 = vmatprep.subr.bf16.mxu1 %v434_v9 }
  0x48   :  { %405 = vmatpush1.bf16.msra.mxu0 %v404_v10 }
  0x4a   :  { %437 = vmatpush3.bf16.msra.mxu1 %v434_v9 }
  0x4b   :  { %179 = vmatmul.mubr.f32.vlgmr.msra.gmra.mrb[0].mxu0 %v47_v47 }
  0x4c   :  { %184 = vmatprep.mubr.f32.mxu0 %v572_v0 }
  0x4d   :  { %372 = vmatmul.mubr.f32.vlgmr.msra.gmra.mrb[0].mxu1 %v48_v11 }
  0x4f   :  { %185 = vmatmul.mubr.f32.gmra.mrb[2].mxu0 %v48_v11 }
 0x11e   :  { %v180_v21 = vpop.f32.mrb[0].mxu0 }
 0x11f   :  { %v181_v22 = vadd.f32 %v180_v21, %v102_v18  ;;  %v182_v23 = vpop.f32.mrb[1].mxu0 }
 0x120   :  { %v183_v24 = vadd.f32 %v182_v23, %v106_v19  ;;  %v373_v25 = vpop.f32.mrb[0].mxu1 }
 0x121   :  { %266 = vst [vmem:[#allocation7] sm:$0xff] %v181_v22  ;;  %v263_v0 = vadd.f32 %v373_v25, %v110_v20  ;;  %v257_v26 = vpop.f32.mrb[1].mxu1 }
 0x122   :  { %268 = vst [vmem:[#allocation8] sm:$0xff] %v183_v24  ;;  %v186_v27 = vpop.f32.mrb[2].mxu0  ;;  %v258_v28 = vadd.f32 %v257_v26, %v110_v20 }
 0x123   :  { %v187_v29 = vadd.f32 %v186_v27, %v102_v18  ;;  %271 = vst [vmem:[#allocation10 + $0x8] sm:$0xff] %v263_v0  ;;  %v188_v30 = vpop.f32.mrb[3].mxu0 }
 0x124   :  { %v189_v31 = vadd.f32 %v188_v30, %v106_v19  ;;  %270 = vst [vmem:[#allocation10] sm:$0xff] %v258_v28 }
 0x125   :  { %267 = vst [vmem:[#allocation7 + $0x8] sm:$0xff] %v187_v29 }
 0x126   :  { %269 = vst [vmem:[#allocation8 + $0x8] sm:$0xff] %v189_v31 }
 0x127   :  { %503 = shalt.err (!%p500_p6)
}
 0x128   :  { %s504_s6 = scalar_lea.hbm %s700_s3, 256 }
 0x129   :  { %p505_p7 = scmp.ne.s32.totalorder %s700_s3, %s504_s6  ;;  %p508_p8 = scmp.lt.u32.totalorder %s504_s6, %s700_s3 }
 0x12b   :  { %p510_p9 = pnand %p508_p8, %p505_p7 }
 0x12d   :  { %513 = shalt.err (!%p510_p9)
}
 0x12e   :  { %283 = dma.vmem_to_hbm [thread:$0]  %s278_s22, 256, %s700_s3, [#allocation4], %s567_s28, %s567_s28, %s568_s29  }
 0x12f   :  { %s514_s13 = scalar_lea.vmem %s638_s24, 256  ;;  %p519_p11 = scmp.lt.s32.totalorder %s638_s24, %s638_s24 }
 0x130   :  { %p515_p10 = scmp.ne.s32.totalorder %s638_s24, %s514_s13  ;;  %p520_p12 = scmp.lt.s32.totalorder %s514_s13, %s514_s13 }
 0x132   :  { %p521_p13 = por %p520_p12, %p519_p11 }
 0x134   :  { %p522_p0 = pnand %p521_p13, %p515_p10 }
 0x136   :  { %525 = shalt.err (!%p522_p0)
}
 0x137   :  { %s526_s16 = scalar_lea.hbm %s701_s4, 256 }
 0x138   :  { %p527_p1 = scmp.ne.s32.totalorder %s701_s4, %s526_s16  ;;  %p530_p2 = scmp.lt.u32.totalorder %s526_s16, %s701_s4 }
 0x13a   :  { %p532_p3 = pnand %p530_p2, %p527_p1 }
 0x13c   :  { %535 = shalt.err (!%p532_p3)
}
 0x13d   :  { %295 = dma.vmem_to_hbm [thread:$0]  %s638_s24, 256, %s701_s4, [#allocation9], %s567_s28, %s567_s28, %s568_s29  }
 0x13e   :  { %s536_s20 = scalar_lea.vmem %s640_s25, 256  ;;  %p541_p5 = scmp.lt.s32.totalorder %s640_s25, %s640_s25 }
 0x13f   :  { %p537_p4 = scmp.ne.s32.totalorder %s640_s25, %s536_s20  ;;  %p542_p6 = scmp.lt.s32.totalorder %s536_s20, %s536_s20 }
 0x141   :  { %p543_p7 = por %p542_p6, %p541_p5 }
 0x143   :  { %p544_p8 = pnand %p543_p7, %p537_p4 }
 0x145   :  { %547 = shalt.err (!%p544_p8)
}
 0x146   :  { %s548_s23 = scalar_lea.hbm %s702_s5, 256 }
 0x147   :  { %p549_p9 = scmp.ne.s32.totalorder %s702_s5, %s548_s23  ;;  %p552_p10 = scmp.lt.u32.totalorder %s548_s23, %s702_s5 }
 0x149   :  { %p554_p11 = pnand %p552_p10, %p549_p9 }
 0x14b   :  { %557 = shalt.err (!%p554_p11)
}
 0x14c   :  { %307 = dma.vmem_to_hbm [thread:$0]  %s640_s25, 256, %s702_s5, [#allocation9], %s567_s28, %s567_s28, %s568_s29  }
 0x14d   :  { %562 = dma.done.wait [#allocation4], 256  }
 0x14e   :  { %563 = vsyncadd [#allocation4], 4294967040 }
 0x14f   :  { %564 = dma.done.wait [#allocation9], 512  }
 0x150   :  { %565 = vsyncadd [#allocation9], 4294966784 }
 0x151   :  { %317 = vsyncpa [#allocation3], 1 }
 0x152   :  { %318 = vsyncpa [#allocation6], 1 }
 0x153   :  { %319 = vsyncpa [#allocation4], 1 }
 0x154   :  { %320 = vsyncpa [#allocation9], 1 }

</bundles_post_ra>
